<compile_context>
chip_gen: v6e
topology: v6e:2x2x1
jax: 0.10.0
libtpu: 0.0.40
codegen_flags: <defaults>
</compile_context>

<pallas_src>
import math

import jax
import jax.numpy as jnp
from jax.experimental import pallas as pl
from jax.experimental.pallas import tpu as pltpu


def _coord_kernel(fc_ref, grid_ref, o_ref):
    # fc_ref:   (C, 2)        fourier coefficients (tiny, resident)
    # grid_ref: (2, TILE_HW)  column slice of the flattened coordinate grid
    # o_ref:    (C, TILE_HW)
    fx = fc_ref[:, 0:1]            # (C, 1) sublane vector
    fy = fc_ref[:, 1:2]
    gx = grid_ref[0:1, :]          # (1, T) lane vector
    gy = grid_ref[1:2, :]
    phase = fx * gx + fy * gy      # (C, T): two VPU broadcast mul-adds (no MXU)
    o_ref[...] = jnp.sin(phase).astype(o_ref.dtype)   # lane-dense, unmasked store


def _round_up(v, m):
    return ((v + m - 1) // m) * m


def _vmem_capacity_bytes():
    try:
        info = pltpu.get_tpu_info()
        cap = getattr(info, "vmem_capacity_bytes", None)
        if cap:
            return int(cap)
    except Exception:
        pass
    return 64 * 1024 * 1024   # conservative fallback (v7x physical VMEM per TC)


def coordinate_input_pallas(input_x, fourier_coefficients, grid_xy, *,
                            out_dtype=jnp.float32):
    """Pallas equivalent of CoordinateInput.forward(input, grid=None).

    input_x:               (B, ...) -- only batch size is used (matches PyTorch).
    fourier_coefficients:  (C, 2)
    grid_xy:               (2, H, W)
    returns:               (B, C, H, W) out_dtype (default f32, bit-compatible ref)
    """
    batch = input_x.shape[0]
    C = fourier_coefficients.shape[0]
    _, H, W = grid_xy.shape
    HW = H * W

    fc = fourier_coefficients.astype(jnp.float32)
    grid_flat = grid_xy.reshape(2, HW).astype(jnp.float32)

    out_itemsize = jnp.dtype(out_dtype).itemsize

    # ---- VMEM-budget-driven lane tile ------------------------------------
    # Double-buffered (2, T) f32 input + (C, T) output tiles; fc is negligible.
    vmem_cap = _vmem_capacity_bytes()
    budget = min(vmem_cap // 2, 48 * 1024 * 1024)
    per_lane = 2 * (2 * 4 + C * out_itemsize)
    max_tile = max(128, (budget // per_lane) // 128 * 128)

    hw_128 = _round_up(HW, 128)                    # keep every store unmasked
    num_tiles = max(1, pl.cdiv(hw_128, max_tile))
    if hw_128 >= 256:
        num_tiles = max(num_tiles, 2)              # >=2 grid steps: both v7x TCs
    tile_hw = pl.cdiv(hw_128 // 128, num_tiles) * 128
    hw_pad = num_tiles * tile_hw                   # adds < num_tiles*128 lanes

    if hw_pad != HW:
        grid_flat = jnp.pad(grid_flat, ((0, 0), (0, hw_pad - HW)))

    needed = 2 * tile_hw * (2 * 4 + C * out_itemsize) + 4 * 2 * C
    vmem_limit = int(min(int(vmem_cap * 0.9),
                         max(needed + (16 << 20), 32 << 20)))

    ff_flat = pl.pallas_call(
        _coord_kernel,
        out_shape=jax.ShapeDtypeStruct((C, hw_pad), out_dtype),
        grid_spec=pltpu.PrefetchScalarGridSpec(
            num_scalar_prefetch=0,
            grid=(num_tiles,),
            in_specs=[
                pl.BlockSpec((C, 2), lambda t: (0, 0)),        # tiny, resident
                pl.BlockSpec((2, tile_hw), lambda t: (0, t)),  # grid column slice
            ],
            out_specs=pl.BlockSpec((C, tile_hw), lambda t: (0, t)),
        ),
        compiler_params=pltpu.CompilerParams(
            dimension_semantics=("parallel",),
            vmem_limit_bytes=vmem_limit,
        ),
    )(fc, grid_flat)

    ff = ff_flat[:, :HW].reshape(C, H, W)
    # Batch "repeat" is a pure broadcast; keep it fused into the consumer.
    return jnp.broadcast_to(ff[None], (batch, C, H, W))


def make_coordinate_input_params(size, num_features):
    """Deterministic re-creation of CoordinateInput.__init__ buffers."""
    log_size = int(math.log(size, 2))

    # torch.meshgrid(y, x) (indexing='ij'), then stack([grid_x, grid_y])
    x = jnp.linspace(-1.0, 1.0, size, dtype=jnp.float32)
    y = jnp.linspace(-1.0, 1.0, size, dtype=jnp.float32)
    grid_x = jnp.broadcast_to(x[None, :], (size, size))   # varies along W
    grid_y = jnp.broadcast_to(y[:, None], (size, size))   # varies along H
    grid_xy = jnp.stack([grid_x, grid_y], axis=0)          # (2, H, W)

    num_x = (num_features - 2) // 2
    num_y = num_features - 2 - num_x
    # torch.logspace(-3, log_size, base=2, steps=n) == 2 ** linspace(-3, log_size, n)
    fourier_x = (2.0 ** jnp.linspace(-3.0, float(log_size), num_x)) * 3.14
    fourier_y = (2.0 ** jnp.linspace(-3.0, float(log_size), num_y)) * 3.14
    fourier_x = jnp.stack([fourier_x, jnp.zeros((num_x,), jnp.float32)], axis=1)
    fourier_y = jnp.stack([jnp.zeros((num_y,), jnp.float32), fourier_y], axis=1)
    cartesian = jnp.array([[0.1, 0.0], [0.0, 0.1]], dtype=jnp.float32)
    fourier_coefficients = jnp.concatenate([fourier_x, fourier_y, cartesian], axis=0)
    assert fourier_coefficients.shape[0] == num_features
    return grid_xy, fourier_coefficients


def coordinate_input_ref(input_x, fourier_coefficients, grid_xy):
    """Pure-JAX reference (mirrors the PyTorch forward)."""
    batch = input_x.shape[0]
    ff = jnp.sin(
        (grid_xy[:, None, :, :] * fourier_coefficients.T[:, :, None, None]).sum(axis=0)
    )
    return jnp.broadcast_to(ff[None], (batch,) + ff.shape)


if __name__ == "__main__":
    size = 16
    num_features = 8
    batch = 2
    in_channels = 4

    key = jax.random.PRNGKey(0)
    # Only input.shape[0] is used by the forward pass, but build a realistic input.
    input_x = jax.random.normal(key, (batch, in_channels, size, size), dtype=jnp.float32)

    grid_xy, fourier_coefficients = make_coordinate_input_params(size, num_features)

    out = coordinate_input_pallas(input_x, fourier_coefficients, grid_xy)
    out = jax.block_until_ready(out)

    ref = coordinate_input_ref(input_x, fourier_coefficients, grid_xy)
    assert out.shape == (batch, num_features, size, size), out.shape
    assert jnp.allclose(out, ref, atol=1e-5, rtol=1e-5), float(jnp.max(jnp.abs(out - ref)))

    print("KERNEL_OK")
</pallas_src>

<mosaic_0001>
module attributes {stable_mosaic.version = 11 : i64} {
  func.func @_coord_kernel(%arg0: i32, %arg1: memref<8x2xf32, #tpu.memory_space<vmem>>, %arg2: memref<2x128xf32, #tpu.memory_space<vmem>>, %arg3: memref<8x128xf32, #tpu.memory_space<vmem>>) attributes {dimension_semantics = [#tpu.dimension_semantics<parallel>], iteration_bounds = array<i64: 2>, scalar_prefetch = 0 : i64, scratch_operands = 0 : i64, tpu.core_type = #tpu.core_type<tc>, window_params = [{pipeline_mode = #tpu.pipeline_mode<synchronous>, transform_indices = @transform_0, window_bounds = array<i64: 8, 2>}, {transform_indices = @transform_1, window_bounds = array<i64: 2, 128>}, {transform_indices = @transform_2, window_bounds = array<i64: 8, 128>}]} {
    %c0 = arith.constant 0 : index
    %c0_0 = arith.constant 0 : index
    %0 = vector.load %arg1[%c0, %c0_0] : memref<8x2xf32, #tpu.memory_space<vmem>>, vector<8x1xf32>
    %c0_1 = arith.constant 0 : index
    %c1 = arith.constant 1 : index
    %1 = vector.load %arg1[%c0_1, %c1] : memref<8x2xf32, #tpu.memory_space<vmem>>, vector<8x1xf32>
    %c0_2 = arith.constant 0 : index
    %c0_3 = arith.constant 0 : index
    %2 = vector.load %arg2[%c0_2, %c0_3] : memref<2x128xf32, #tpu.memory_space<vmem>>, vector<1x128xf32>
    %c1_4 = arith.constant 1 : index
    %c0_5 = arith.constant 0 : index
    %3 = vector.load %arg2[%c1_4, %c0_5] : memref<2x128xf32, #tpu.memory_space<vmem>>, vector<1x128xf32>
    %4 = vector.broadcast %0 : vector<8x1xf32> to vector<8x128xf32>
    %5 = vector.broadcast %2 : vector<1x128xf32> to vector<8x128xf32>
    %6 = arith.mulf %4, %5 : vector<8x128xf32>
    %7 = vector.broadcast %1 : vector<8x1xf32> to vector<8x128xf32>
    %8 = vector.broadcast %3 : vector<1x128xf32> to vector<8x128xf32>
    %9 = arith.mulf %7, %8 : vector<8x128xf32>
    %10 = arith.addf %6, %9 : vector<8x128xf32>
    %11 = math.sin %10 : vector<8x128xf32>
    %c0_6 = arith.constant 0 : index
    %c0_7 = arith.constant 0 : index
    %12 = vector.load %arg3[%c0_6, %c0_7] : memref<8x128xf32, #tpu.memory_space<vmem>>, vector<8x128xf32>
    tpu.vector_store %arg3[%c0_6, %c0_7], %11 {strides = array<i32>} : memref<8x128xf32, #tpu.memory_space<vmem>>, vector<8x128xf32>,
    return
  }
  func.func @transform_0(%arg0: i32) -> (i32, i32) {
    %c0_i32 = arith.constant 0 : i32
    %c0_i32_0 = arith.constant 0 : i32
    %c0_i32_1 = arith.constant 0 : i32
    return %c0_i32, %c0_i32_0 : i32, i32
  }
  func.func @transform_1(%arg0: i32) -> (i32, i32) {
    %c0_i32 = arith.constant 0 : i32
    %c0_i32_0 = arith.constant 0 : i32
    return %c0_i32, %arg0 : i32, i32
  }
  func.func @transform_2(%arg0: i32) -> (i32, i32) {
    %c0_i32 = arith.constant 0 : i32
    %c0_i32_0 = arith.constant 0 : i32
    return %c0_i32, %arg0 : i32, i32
  }
}

</mosaic_0001>

<bundles_post_ra>
// kernel: tpu_custom_call.1
= control target key start
LH: loop header
LB: loop body
LE: loop exit
PB: predicated region body
PF: predicated region fallthrough
CT: control target
= control target key end

     0   :  { %7 = vsyncpa [#allocation3], 0  ;;  %s616_s0 = inlined_call_operand.vmem [shape: f32[8,2], index: 0, kind: input, shape index: {}]   ;;  %s617_s1 = inlined_call_operand.vmem [shape: f32[2,256], index: 1, kind: input, shape index: {}]   ;;  %s618_s2 = inlined_call_operand.hbm [shape: f32[8,256], index: 2, kind: output, shape index: {}]  }
   0x1   :  { %9 = vsyncpa [#allocation3 + $0x1], 0  ;;  %s499_s9 = smov 0   ;;  %s501_s10 = smov 0  }
   0x2   :  { %s503_s11 = smov 0   ;;  %s505_s12 = smov 0  }
   0x3 LB: > { %s520_s13 = sadd.s32 4294967295, %s473_s12   ;;  %s340_s14 = sadd.s32 4294967294, %s473_s12   ;;  %s473_s12 = sphi %s505_s12, %s624_s12   ;;  %s469_s11 = sphi %s503_s11, %s623_s11   ;;  %s465_s10 = sphi %s501_s10, %s622_s10   ;;  %s461_s9 = sphi %s499_s9, %s621_s9  }
   0x4   : > { %s524_s15 = sadd.s32 1, %s473_s12   ;;  %s69_s16 = sadd.s32 1, %s469_s11 }
   0x5   : > { %s66_s17 = ssub.s32 %s473_s12, %s524_s15  ;;  %p79_p0 = scmp.ne.s32.totalorder %s469_s11, %s465_s10 }
   0x6   : > { %p67_p1 = scmp.eq.s32.totalorder %s66_s17, 0  ;;  %p80_p2 = scmp.eq.s32.totalorder %s520_s13, 1 }
   0x7   : > { %p85_p3 = scmp.ne.s32.totalorder %s465_s10, %s461_s9  ;;  %p86_p4 = scmp.eq.s32.totalorder %s340_s14, 1 }
   0x8   : > { %s535_s18 = scalar_select %p67_p1, %s469_s11, %s69_s16  }
   0x9   : > { %p537_p5 = por %p80_p2, %p79_p0  ;;  %p541_p6 = por %p86_p4, %p85_p3 }
   0xa   : > { %p343_p7 = scmp.ge.s32.totalorder %s473_s12, 1  ;;  %p114_p8 = scmp.lt.s32.totalorder %s473_s12, 3 }
   0xc   : > { %p115_p9 = pnand %p343_p7, %p114_p8 }
   0xd   : > { %p135_p10 = scmp.lt.s32.totalorder (!%p115_p9), %s520_s13, 1  ;;  %s132_s28 = sand.u32 (!%p115_p9), 1, %s465_s10  }
   0xe   : > { %118 = sbr.rel (%p115_p9) target bundleno = 249 (0xf9), region = 28  ;;  %s344_s29 = sshll.u32 (!%p115_p9), %s132_s28, 3 }
   0xf   : > { %s353_s30 = sshll.u32 (!%p115_p9), %s520_s13, 7  ;;  %s134_s3 = scalar_lea.vmem (!%p115_p9), [#allocation2], %s344_s29 }
  0x10   : > { %s281_s4 = sshll.u32 (!%p115_p9), %s134_s3, 4  ;;  %s581_s7 = scalar_lea.hbm (!%p115_p9), %s618_s2, %s353_s30  ;;  %s282_s4 = int_to_ptr.vmem [resolvable:$true] %s281_s4 }
  0x11   : > { %s268_s8 = scalar_lea.sflag (!%p115_p9), [#allocation3], %s132_s28  ;;  %s483_s14 = smov (!%p115_p9), [#allocation2]  }
  0x12   : > { %s417_s16 = sshll.u32 (!%p115_p9), %s483_s14, 4  ;;  %s418_s16 = int_to_ptr.vmem [resolvable:$false] %s417_s16 }
  0x13   : > { %v139_v0 = vld [vmem:[%s616_s0] sm:$0xff]  ;;  %v475_v1 = vmov 0   ;;  %v476_v2 = vmov 1   ;;  %s136_s23 = scalar_select %p135_p10, %s520_s13, 1  ;;  %v477_v20 = vmov 683565275  }
  0x14   : > { %407 = vset.pattern.permute.xlu0 %v475_v1  ;;  %v478_v22 = vmov 2475754826   ;;  %v479_v25 = vmov 2131351028   ;;  %v480_v28 = vmov 2102212464   ;;  %p420_p0 = scmp.lt.s32.totalorder %s282_s4, %s418_s16 }
  0x15   : > { %144 = vperm.xlu0 %407, %v139_v0   ;;  %s345_s24 = sshll.u32 %s136_s23, 1  ;;  %v481_v31 = vmov 920167782   ;;  %v482_v34 = vmov 1326507024   ;;  %s413_s13 = scalar_lea.vmem %s282_s4, 128 }
  0x16   : > { %s138_s27 = scalar_lea.vmem %s617_s1, %s345_s24  ;;  %p414_p11 = scmp.ne.s32.totalorder %s282_s4, %s413_s13 }
  0x17   : > { %v346_v4 = vld [vmem:[%s138_s27] ss:$0 sm:$0xff]  ;;  %v347_v5 = vld [vmem:[%s138_s27 + $0x1] ss:$0 sm:$0xff]  ;;  %s419_s17 = scalar_lea.vmem %s418_s16, 256 }
  0x18   : > { %p415_p12 = pnand %p414_p11, %p537_p5  ;;  %p421_p1 = scmp.lt.s32.totalorder %s419_s17, %s413_s13 }
  0x19   : > { %408 = vset.pattern.permute.xlu0 %v476_v2 }
  0x1a   : > { %153 = vperm.xlu0 %408, %v139_v0   ;;  %p416_p13 = pneg %p415_p12  ;;  %p422_p2 = por %p421_p1, %p420_p0 }
  0x1c   : > { %p423_p3 = pnand %p422_p2, %p416_p13 }
  0x90   : > { %v145_v3 = vpop.permute.xlu0 %144 }
  0x91   : > { %v151_v7 = vmul.f32 %v346_v4, %v145_v3 }
  0x95   : > { %v154_v6 = vpop.permute.xlu0 %153 }
  0x96   : > { %v160_v8 = vmul.f32 %v347_v5, %v154_v6 }
  0x98   : > { %v555_v9 = vadd.f32 %v160_v8, %v151_v7 }
  0x9a   : > { %v165_v10 = vand.u32 2139095040, %v555_v9  ;;  %v162_v14 = vand.u32 2147483647, %v555_v9  ;;  %vm164_vm7 = vcmp.lt.s32.totalorder %v555_v9, 0  ;;  %vm254_vm12 = vweird.f32 %v555_v9 }
  0x9c   : > { %v166_v11 = vshrl.u32 %v165_v10, 23  ;;  %v169_v17 = vand.u32 8388607, %v162_v14  ;;  %vm163_vm8 = vcmp.le.f32.partialorder %v162_v14, 0.7853982 }
  0x9e   : > { %v348_v12 = vadd.s32 4294967169, %v166_v11  ;;  %v170_v36 = vor.u32 8388608, %v169_v17 }
  0xa0   : > { %v172_v13 = vadd.s32 1, %v348_v12  ;;  %v210_v50 = vshll.u32 %v170_v36, 8 }
  0xa2   : > { %vm173_vm0 = vcmp.gt.s32.totalorder %v172_v13, 0 }
  0xa3   : > { %v174_v15 = vsel %vm173_vm0, %v172_v13, 0 }
  0xa4   : > { %v176_v16 = vand.u32 31, %v174_v15  ;;  %v175_v19 = vshrl.u32 %v174_v15, 5 }
  0xa6   : > { %v177_v18 = vsub.s32 32, %v176_v16  ;;  %v179_v21 = vshll.u32 %v477_v20, %v176_v16  ;;  %v182_v23 = vshll.u32 %v478_v22, %v176_v16  ;;  %v185_v27 = vshll.u32 %v479_v25, %v176_v16 }
  0xa7   : > { %v188_v30 = vshll.u32 %v480_v28, %v176_v16  ;;  %v191_v33 = vshll.u32 %v481_v31, %v176_v16  ;;  %vm194_vm1 = vcmp.lt.s32.totalorder %v175_v19, 1  ;;  %vm197_vm2 = vcmp.lt.s32.totalorder %v175_v19, 4 }
  0xa8   : > { %v180_v24 = vshrl.u32 %v478_v22, %v177_v18  ;;  %v183_v26 = vshrl.u32 %v479_v25, %v177_v18  ;;  %v186_v29 = vshrl.u32 %v480_v28, %v177_v18  ;;  %v189_v32 = vshrl.u32 %v481_v31, %v177_v18 }
  0xa9   : > { %v192_v35 = vshrl.u32 %v482_v34, %v177_v18  ;;  %v178_v45 = vshrl.u32 %v477_v20, %v177_v18  ;;  %vm196_vm3 = vcmp.lt.s32.totalorder %v175_v19, 3  ;;  %vm195_vm4 = vcmp.lt.s32.totalorder %v175_v19, 2 }
  0xaa   : > { %v181_v37 = vor.u32 %v180_v24, %v179_v21  ;;  %v184_v38 = vor.u32 %v183_v26, %v182_v23  ;;  %v187_v39 = vor.u32 %v186_v29, %v185_v27  ;;  %v190_v40 = vor.u32 %v189_v32, %v188_v30 }
  0xab   : > { %v193_v41 = vor.u32 %v192_v35, %v191_v33 }
  0xac   : > { %v199_v42 = vsel %vm197_vm2, %v187_v39, 2102212464  ;;  %v202_v43 = vsel %vm194_vm1, %v181_v37, %v184_v38  ;;  %v206_v44 = vsel %vm194_vm1, %v184_v38, %v187_v39  ;;  %v203_v46 = vsel %vm197_vm2, %v190_v40, 920167782 }
  0xad   : > { %v207_v47 = vsel %vm197_vm2, %v193_v41, 1326507024  ;;  %v204_v48 = vsel %vm196_vm3, %v187_v39, %v203_v46  ;;  %v198_v51 = vsel %vm194_vm1, %v178_v45, %v181_v37  ;;  %v200_v52 = vsel %vm196_vm3, %v184_v38, %v199_v42 }
  0xae   : > { %v208_v49 = vsel %vm196_vm3, %v190_v40, %v207_v47  ;;  %v205_v53 = vsel %vm195_vm4, %v202_v43, %v204_v48  ;;  %v201_v59 = vsel %vm195_vm4, %v198_v51, %v200_v52 }
  0xaf   : > { %v209_v54 = vsel %vm195_vm4, %v206_v44, %v208_v49  ;;  %v564_v57 = vmul.u32.u64.low %v210_v50, %v205_v53  ;;  %v565_v58 = vmul.u32.u64.high %v210_v50, %v205_v53, %v564_v57  ;;  %v217_v61 = vmul.u32 %v210_v50, %v201_v59 }
  0xb0   : > { %v561_v55 = vmul.u32.u64.low %v210_v50, %v209_v54  ;;  %v562_v56 = vmul.u32.u64.high %v210_v50, %v209_v54, %v561_v55 }
  0xb1   : > { %v220_v60 = vadd.s32 1, %v565_v58 }
  0xb2   : > { %vm219_vm5 = vc.u32 %v562_v56, %v564_v57  ;;  %v218_v10 = vadd.s32 %v564_v57, %v562_v56 }
  0xb3   : > { %v221_v62 = vsel %vm219_vm5, %v220_v60, %v565_v58 }
  0xb4   : > { %v222_v63 = vadd.s32 %v221_v62, %v217_v61 }
  0xb6   : > { %v223_v0 = vadd.s32 536870912, %v222_v63 }
  0xb8   : > { %v224_v1 = vshrl.u32 %v223_v0, 30 }
  0xba   : > { %v225_v2 = vshll.u32 %v224_v1, 30  ;;  %v248_v24 = vsub.s32 4, %v224_v1 }
  0xbc   : > { %v226_v3 = vsub.s32 %v222_v63, %v225_v2  ;;  %v249_v27 = vsel %vm164_vm7, %v248_v24, %v224_v1 }
  0xbd   : > { %v251_v28 = vsel %vm163_vm8, 0, %v249_v27 }
  0xbe   : > { %v228_v4 = vsub.s32 0, %v226_v3  ;;  %v255_v29 = vadd.s32 3, %v251_v28 }
  0xc0   : > { %v349_v5 = vmin.u32 %v228_v4, %v226_v3  ;;  %v256_v30 = vand.u32 3, %v255_v29 }
  0xc2   : > { %v230_v6 = vclz %v349_v5  ;;  %vm261_vm9 = vcmp.eq.s32.totalorder %v256_v30, 2  ;;  %vm258_vm10 = vcmp.eq.s32.totalorder %v256_v30, 0  ;;  %vm257_vm11 = vcmp.lt.s32.totalorder %v256_v30, 2 }
  0xc4   : > { %v350_v7 = vadd.s32 4294967294, %v230_v6 }
  0xc6   : > { %vm351_vm6 = vcmp.lt.s32.totalorder %v350_v7, 0 }
  0xc7   : > { %v233_v8 = vsel %vm351_vm6, 0, %v350_v7 }
  0xc8   : > { %v234_v11 = vsub.s32 32, %v233_v8  ;;  %v238_v12 = vsub.s32 4294967266, %v233_v8  ;;  %v235_v13 = vshll.u32 %v226_v3, %v233_v8 }
  0xca   : > { %v236_v15 = vshrl.u32 %v218_v10, %v234_v11  ;;  %v239_v16 = vadd.s32 127, %v238_v12 }
  0xcc   : > { %v237_v17 = vor.u32 %v236_v15, %v235_v13  ;;  %v240_v18 = vshll.u32 %v239_v16, 23 }
  0xce   : > { %v241_v19 = vor.u32 4788187, %v240_v18  ;;  %v244_v21 = vcvt.s32.f32 %v237_v17 }
  0xd0   : > { %v242_v20 = vand.u32 2147483647, %v241_v19 }
  0xd2   : > { %v245_v22 = vmul.f32 %v244_v21, %v242_v20 }
  0xd4   : > { %v246_v23 = vxor.u32 2147483648, %v245_v22 }
  0xd6   : > { %v247_v25 = vsel %vm164_vm7, %v246_v23, %v245_v22 }
  0xd7   : > { %v250_v26 = vsel %vm163_vm8, %v555_v9, %v247_v25 }
  0xd8   : > { %409 = vcosq.f32 %v250_v26 }
  0xd9   : > { %411 = vsinq.f32 %v250_v26 }
  0xe5   : > { %v410_v31 = vpop.eup %409 }
  0xe6   : > { %v412_v32 = vpop.eup %411  ;;  %v262_v33 = vxor.u32 2147483648, %v410_v31 }
  0xe7   : > { %v259_v34 = vxor.u32 2147483648, %v412_v32 }
  0xe8   : > { %v263_v14 = vsel %vm261_vm9, %v262_v33, %v412_v32 }
  0xe9   : > { %v260_v35 = vsel %vm258_vm10, %v410_v31, %v259_v34 }
  0xea   : > { %v264_v36 = vsel %vm257_vm11, %v260_v35, %v263_v14 }
  0xeb   : > { %v265_v37 = vsel %vm254_vm12, nan, %v264_v36 }
  0xec   : > { %266 = vst [vmem:[%s134_s3] sm:$0xff] %v265_v37 }
  0xed   : > { %426 = shalt.err (!%p423_p3)
}
  0xee   : > { %s427_s21 = scalar_lea.hbm %s581_s7, 128  ;;  %s431_s24 = scalar_lea.hbm %s618_s2, 256 }
  0xef   : > { %p428_p4 = scmp.ne.s32.totalorder %s581_s7, %s427_s21  ;;  %p432_p9 = scmp.lt.s32.totalorder %s581_s7, %s618_s2 }
  0xf0   : > { %p433_p10 = scmp.lt.s32.totalorder %s431_s24, %s427_s21 }
  0xf1   : > { %p429_p7 = pnand %p428_p4, %p537_p5 }
  0xf2   : > { %p434_p11 = por %p433_p10, %p432_p9 }
  0xf3   : > { %p430_p8 = pneg %p429_p7 }
  0xf5   : > { %p435_p12 = pnand %p434_p11, %p430_p8 }
  0xf7   : > { %438 = shalt.err (!%p435_p12)
}
  0xf8   : > { %360 = dma.vmem_to_hbm [thread:$0]  (%p537_p5), %s282_s4, 128, %s581_s7, %s268_s8  }
  0xf9 PF: > { %p366_p13 = scmp.ge.s32.totalorder %s473_s12, 2  ;;  %s293_s27 = sand.u32 1, %s461_s9  }
  0xfa   : > { %s294_s28 = scalar_lea.sflag [#allocation3], %s293_s27 }
  0xfb   : > { %p363_p0 = pnand %p366_p13, %p541_p6 }
  0xfd   : > { %p364_p1 = pneg %p363_p0 }
  0xff   : > { %456 = dma.done.wait (%p364_p1), %s294_s28, 128  }
 0x100   : > { %458 = vsyncadd (%p364_p1), %s294_s28, 4294967168  ;;  %p12_p2 = scmp.ge.s32.totalorder %s524_s15, 4   ;;  %s621_s9 = smov %s465_s10 }
 0x101   : > { %s622_s10 = smov %s469_s11  ;;  %s623_s11 = smov %s535_s18 }
 0x102   : > { %s624_s12 = smov %s524_s15  ;;  %14 = sbr.rel (!%p12_p2) target bundleno = 3 (0x3), region = 63 }
 0x107   :  { %299 = vsyncpa [#allocation3], 1 }
 0x108   :  { %301 = vsyncpa [#allocation3 + $0x1], 1 }

</bundles_post_ra>
